<compile_context>
chip_gen: v5e
topology: v5e:2x2
jax: 0.10.0
libtpu: 0.0.40
codegen_flags: <defaults>
</compile_context>

<pallas_src>
import jax
import jax.numpy as jnp
from jax.experimental import pallas as pl
from jax.experimental.pallas import tpu as pltpu

EPS = 1e-5
NEG_SLOPE = 0.02
KH = KW = 4
STRIDE = 2
PAD = 1
LANE = 128


def _round_up(x, m):
    return (x + m - 1) // m * m


def _vmem_capacity_bytes():
    try:
        return int(pltpu.get_tpu_info().vmem_capacity_bytes)
    except Exception:  # older jax / query failure -> conservative (v7x) default
        return 64 * 1024 * 1024


_VMEM_CAP = _vmem_capacity_bytes()
# v5e/v6e: 128 MiB physical VMEM -> 1024-wide spatial tiles, ~96 MiB scoped cap.
# v7x:      64 MiB physical VMEM -> 512-wide spatial tiles, ~48 MiB scoped cap.
MAX_TILE_S = 1024 if _VMEM_CAP >= (100 << 20) else 512
VMEM_LIMIT = min(96 << 20, (_VMEM_CAP * 3) // 4)


def _pick_tile_s(s, max_tile):
    """Spatial tile: divides the (possibly padded) per-image spatial size and is
    lane-dense (multiple of 128), unless one tile covers the whole image."""
    if s <= max_tile:
        return s, s
    top = max_tile - max_tile % LANE
    for t in range(top, LANE - 1, -LANE):
        if s % t == 0:
            return t, s
    return top, _round_up(s, top)  # pad spatial dim; sliced off in the wrapper


# --------------------------------------------------------------------------
# Pass 1: channel-major conv on the MXU (bf16 in / f32 acc) + per-tile per-
# channel partial (sum, sum_sq) taken from the f32 result before the bf16 cast.
# --------------------------------------------------------------------------
def _conv_stats_kernel(colsT_ref, w_ref, conv_ref, sum_ref, sq_ref):
    # colsT_ref: (1, K_pad, TILE_S) bf16    w_ref: (C_mat, K_pad) bf16
    # conv_ref:  (1, Cout, TILE_S) bf16     sum/sq: (1, 1, Cout, 1) f32
    conv = jnp.dot(w_ref[...], colsT_ref[0],
                   preferred_element_type=jnp.float32)   # (C_mat, TILE_S) f32
    conv = conv[:conv_ref.shape[1], :]                   # drop zero-padded rows
    # BN partial sums from the f32 accumulation (before the bf16 cast).
    sum_ref[0, 0] = jnp.sum(conv, axis=1, keepdims=True)
    sq_ref[0, 0] = jnp.sum(conv * conv, axis=1, keepdims=True)
    conv_ref[0] = conv.astype(conv_ref.dtype)


# --------------------------------------------------------------------------
# Pass 2: folded BN (scale/shift precomputed in JAX glue) + LeakyReLU.
# Pure FMA + select streaming kernel; writes NCHW-flattened output directly.
# --------------------------------------------------------------------------
def _bn_lrelu_kernel(conv_ref, scale_ref, shift_ref, out_ref):
    # conv_ref: (1, Cout, TILE_S) bf16   scale/shift: (Cout, 1) f32
    y = conv_ref[0].astype(jnp.float32) * scale_ref[...] + shift_ref[...]
    out_ref[0] = jnp.where(y >= 0.0, y, NEG_SLOPE * y)


# --------------------------------------------------------------------------
# Wrapper glue (plain JAX): channel-major im2col (bf16), padding, reshapes.
# --------------------------------------------------------------------------
def _im2col_T(x_nhwc, ho, wo):
    """4x4 stride-2 pad-1 patches, channel-major: returns (B, KH*KW*Cin, Ho*Wo)."""
    b, _, _, cin = x_nhwc.shape
    xp = jnp.pad(x_nhwc, ((0, 0), (PAD, PAD), (PAD, PAD), (0, 0)))
    patches = []
    for kh in range(KH):
        for kw in range(KW):
            patches.append(
                xp[:, kh:kh + STRIDE * ho:STRIDE, kw:kw + STRIDE * wo:STRIDE, :])
    cols = jnp.stack(patches, axis=1)              # (B, 16, Ho, Wo, Cin)
    cols = jnp.transpose(cols, (0, 1, 4, 2, 3))    # (B, 16, Cin, Ho, Wo)
    return cols.reshape(b, KH * KW * cin, ho * wo)


@jax.jit
def downsample_block(x_nchw, weight, bias, gamma, beta):
    """Forward of DownSampleBlock. NCHW in -> NCHW out (B, Cout, H//2, W//2)."""
    del bias  # cancelled exactly by training-mode BN mean subtraction (dead work)

    b, cin, h, w = x_nchw.shape
    cout = weight.shape[0]
    ho = (h + 2 * PAD - KH) // STRIDE + 1
    wo = (w + 2 * PAD - KW) // STRIDE + 1
    s = ho * wo
    k = KH * KW * cin

    k_pad = _round_up(k, LANE)
    c_mat = _round_up(cout, 8)                 # MXU lhs rows (sublane aligned)
    tile_s, s_pad = _pick_tile_s(s, MAX_TILE_S)
    n_sp = s_pad // tile_s

    # bf16 MXU feeds; f32 kept for statistics and the final output.
    x_nhwc = jnp.transpose(x_nchw, (0, 2, 3, 1)).astype(jnp.bfloat16)
    colsT = _im2col_T(x_nhwc, ho, wo)                                   # (B, K, S)
    colsT = jnp.pad(colsT, ((0, 0), (0, k_pad - k), (0, s_pad - s)))
    w_t = jnp.transpose(weight, (0, 2, 3, 1)).reshape(cout, k).astype(jnp.bfloat16)
    w_t = jnp.pad(w_t, ((0, c_mat - cout), (0, k_pad - k)))

    # ---- pass 1: tiled channel-major conv + per-tile channel partial sums ----
    convT, sum_parts, sq_parts = pl.pallas_call(
        _conv_stats_kernel,
        grid=(b, n_sp),
        in_specs=[
            pl.BlockSpec((1, k_pad, tile_s), lambda bi, j: (bi, 0, j)),
            pl.BlockSpec((c_mat, k_pad), lambda bi, j: (0, 0)),
        ],
        out_specs=(
            pl.BlockSpec((1, cout, tile_s), lambda bi, j: (bi, 0, j)),
            pl.BlockSpec((1, 1, cout, 1), lambda bi, j: (bi, j, 0, 0)),
            pl.BlockSpec((1, 1, cout, 1), lambda bi, j: (bi, j, 0, 0)),
        ),
        out_shape=(
            jax.ShapeDtypeStruct((b, cout, s_pad), jnp.bfloat16),
            jax.ShapeDtypeStruct((b, n_sp, cout, 1), jnp.float32),
            jax.ShapeDtypeStruct((b, n_sp, cout, 1), jnp.float32),
        ),
        compiler_params=pltpu.CompilerParams(
            dimension_semantics=("parallel", "parallel"),   # megacore-shardable
            vmem_limit_bytes=VMEM_LIMIT,
        ),
        cost_estimate=pl.CostEstimate(
            flops=2 * b * s_pad * k_pad * c_mat,
            transcendentals=0,
            bytes_accessed=(b * k_pad * s_pad * 2 + c_mat * k_pad * 2
                            + b * cout * s_pad * 2 + 2 * b * n_sp * cout * 4),
        ),
    )(colsT, w_t)

    # ---- O(C) BN statistics + constant folding (tiny JAX glue) ----
    inv_count = 1.0 / float(b * s)             # true element count per channel
    sums = jnp.sum(sum_parts, axis=(0, 1, 3))
    sqs = jnp.sum(sq_parts, axis=(0, 1, 3))
    mean = sums * inv_count
    var = jnp.maximum(sqs * inv_count - mean * mean, 0.0)   # clamp f32 cancellation
    scale = gamma.astype(jnp.float32) * jax.lax.rsqrt(var + EPS)
    shift = beta.astype(jnp.float32) - mean * scale
    scale = scale.reshape(cout, 1)
    shift = shift.reshape(cout, 1)

    # ---- pass 2: folded BN + LeakyReLU, NCHW-flattened output ----
    out = pl.pallas_call(
        _bn_lrelu_kernel,
        grid=(b, n_sp),
        in_specs=[
            pl.BlockSpec((1, cout, tile_s), lambda bi, j: (bi, 0, j)),
            pl.BlockSpec((cout, 1), lambda bi, j: (0, 0)),
            pl.BlockSpec((cout, 1), lambda bi, j: (0, 0)),
        ],
        out_specs=pl.BlockSpec((1, cout, tile_s), lambda bi, j: (bi, 0, j)),
        out_shape=jax.ShapeDtypeStruct((b, cout, s_pad), jnp.float32),
        compiler_params=pltpu.CompilerParams(
            dimension_semantics=("parallel", "parallel"),
            vmem_limit_bytes=VMEM_LIMIT,
        ),
        cost_estimate=pl.CostEstimate(
            flops=4 * b * cout * s_pad,
            transcendentals=0,
            bytes_accessed=b * cout * s_pad * (2 + 4) + 2 * cout * 4,
        ),
    )(convT, scale, shift)

    if s_pad == s:
        # Free metadata reshape: (B, Cout, Ho*Wo) -> (B, Cout, Ho, Wo). No slice,
        # no transpose, no extra HBM pass over the output.
        return out.reshape(b, cout, ho, wo)
    return out[:, :, :s].reshape(b, cout, ho, wo)


# --------------------------------------------------------------------------
# Plain-JAX reference (conv WITH bias + train-mode BN + leaky relu), all f32.
# --------------------------------------------------------------------------
def _reference(x_nchw, weight, bias, gamma, beta):
    x_nhwc = jnp.transpose(x_nchw, (0, 2, 3, 1))
    w_hwio = jnp.transpose(weight, (2, 3, 1, 0))
    conv = jax.lax.conv_general_dilated(
        x_nhwc, w_hwio, window_strides=(STRIDE, STRIDE),
        padding=((PAD, PAD), (PAD, PAD)),
        dimension_numbers=("NHWC", "HWIO", "NHWC"),
    ) + bias
    mean = jnp.mean(conv, axis=(0, 1, 2), keepdims=True)
    var = jnp.mean((conv - mean) ** 2, axis=(0, 1, 2), keepdims=True)
    y = (conv - mean) * jax.lax.rsqrt(var + EPS) * gamma + beta
    y = jnp.where(y >= 0, y, NEG_SLOPE * y)
    return jnp.transpose(y, (0, 3, 1, 2))


if __name__ == "__main__":
    B, C_IN, C_OUT, H, W = 2, 4, 8, 16, 16

    key = jax.random.PRNGKey(0)
    kx, kw_, kb, kg, kbt = jax.random.split(key, 5)

    x = jax.random.normal(kx, (B, C_IN, H, W), dtype=jnp.float32)
    weight = jax.random.normal(kw_, (C_OUT, C_IN, KH, KW), dtype=jnp.float32) * 0.1
    bias = jax.random.normal(kb, (C_OUT,), dtype=jnp.float32) * 0.1
    gamma = 1.0 + 0.1 * jax.random.normal(kg, (C_OUT,), dtype=jnp.float32)
    beta = 0.1 * jax.random.normal(kbt, (C_OUT,), dtype=jnp.float32)

    out = jax.block_until_ready(downsample_block(x, weight, bias, gamma, beta))
    ref = _reference(x, weight, bias, gamma, beta)

    assert out.shape == (B, C_OUT, H // 2, W // 2), out.shape
    max_err = float(jnp.max(jnp.abs(out - ref)))
    # bf16 MXU feeds + bf16 conv intermediate -> loosened tolerance vs f32 ref.
    assert jnp.allclose(out, ref, atol=5e-2, rtol=5e-2), max_err

    print("KERNEL_OK")
</pallas_src>

<mosaic_0001>
module attributes {stable_mosaic.version = 11 : i64} {
  func.func @_conv_stats_kernel(%arg0: i32, %arg1: i32, %arg2: memref<1x128x64xbf16, #tpu.memory_space<vmem>>, %arg3: memref<8x128xbf16, #tpu.memory_space<vmem>>, %arg4: memref<1x8x64xbf16, #tpu.memory_space<vmem>>, %arg5: memref<1x1x8x1xf32, #tpu.memory_space<vmem>>, %arg6: memref<1x1x8x1xf32, #tpu.memory_space<vmem>>) attributes {dimension_semantics = [#tpu.dimension_semantics<parallel>, #tpu.dimension_semantics<parallel>], iteration_bounds = array<i64: 2, 1>, scalar_prefetch = 0 : i64, scratch_operands = 0 : i64, tpu.core_type = #tpu.core_type<tc>, window_params = [{transform_indices = @transform_0, window_bounds = array<i64: 1, 128, 64>}, {pipeline_mode = #tpu.pipeline_mode<synchronous>, transform_indices = @transform_1, window_bounds = array<i64: 8, 128>}, {transform_indices = @transform_2, window_bounds = array<i64: 1, 8, 64>}, {transform_indices = @transform_3, window_bounds = array<i64: 1, 1, 8, 1>}, {transform_indices = @transform_4, window_bounds = array<i64: 1, 1, 8, 1>}]} {
    %c0 = arith.constant 0 : index
    %c0_0 = arith.constant 0 : index
    %0 = vector.load %arg3[%c0, %c0_0] : memref<8x128xbf16, #tpu.memory_space<vmem>>, vector<8x128xbf16>
    %c0_1 = arith.constant 0 : index
    %c0_2 = arith.constant 0 : index
    %c0_3 = arith.constant 0 : index
    %1 = vector.load %arg2[%c0_1, %c0_2, %c0_3] : memref<1x128x64xbf16, #tpu.memory_space<vmem>>, vector<1x128x64xbf16>
    %2 = vector.shape_cast %1 : vector<1x128x64xbf16> to vector<128x64xbf16>
    %cst = arith.constant dense<0.000000e+00> : vector<8x64xf32>
    %3 = tpu.matmul %0, %2, %cst {dimension_numbers = #tpu.dot_dimension_numbers<[1], [0], [0], [1], [0, 0, 1, 1], [], []>} : vector<8x128xbf16>, vector<128x64xbf16>, vector<8x64xf32> -> vector<8x64xf32>
    %cst_4 = arith.constant dense<0.000000e+00> : vector<8xf32>
    %4 = vector.multi_reduction <add>, %3, %cst_4 [1] : vector<8x64xf32> to vector<8xf32>
    %5 = vector.shape_cast %4 : vector<8xf32> to vector<8x1xf32>
    %c0_5 = arith.constant 0 : index
    %c0_6 = arith.constant 0 : index
    %c0_7 = arith.constant 0 : index
    %c0_8 = arith.constant 0 : index
    %6 = vector.load %arg5[%c0_5, %c0_6, %c0_7, %c0_8] : memref<1x1x8x1xf32, #tpu.memory_space<vmem>>, vector<1x1x8x1xf32>
    %7 = vector.shape_cast %6 : vector<1x1x8x1xf32> to vector<8x1xf32>
    %8 = vector.shape_cast %5 : vector<8x1xf32> to vector<1x1x8x1xf32>
    tpu.vector_store %arg5[%c0_5, %c0_6, %c0_7, %c0_8], %8 {strides = array<i32>} : memref<1x1x8x1xf32, #tpu.memory_space<vmem>>, vector<1x1x8x1xf32>,
    %9 = arith.mulf %3, %3 : vector<8x64xf32>
    %cst_9 = arith.constant dense<0.000000e+00> : vector<8xf32>
    %10 = vector.multi_reduction <add>, %9, %cst_9 [1] : vector<8x64xf32> to vector<8xf32>
    %11 = vector.shape_cast %10 : vector<8xf32> to vector<8x1xf32>
    %c0_10 = arith.constant 0 : index
    %c0_11 = arith.constant 0 : index
    %c0_12 = arith.constant 0 : index
    %c0_13 = arith.constant 0 : index
    %12 = vector.load %arg6[%c0_10, %c0_11, %c0_12, %c0_13] : memref<1x1x8x1xf32, #tpu.memory_space<vmem>>, vector<1x1x8x1xf32>
    %13 = vector.shape_cast %12 : vector<1x1x8x1xf32> to vector<8x1xf32>
    %14 = vector.shape_cast %11 : vector<8x1xf32> to vector<1x1x8x1xf32>
    tpu.vector_store %arg6[%c0_10, %c0_11, %c0_12, %c0_13], %14 {strides = array<i32>} : memref<1x1x8x1xf32, #tpu.memory_space<vmem>>, vector<1x1x8x1xf32>,
    %15 = arith.truncf %3 : vector<8x64xf32> to vector<8x64xbf16>
    %c0_14 = arith.constant 0 : index
    %c0_15 = arith.constant 0 : index
    %c0_16 = arith.constant 0 : index
    %16 = vector.load %arg4[%c0_14, %c0_15, %c0_16] : memref<1x8x64xbf16, #tpu.memory_space<vmem>>, vector<1x8x64xbf16>
    %17 = vector.shape_cast %16 : vector<1x8x64xbf16> to vector<8x64xbf16>
    %18 = vector.shape_cast %15 : vector<8x64xbf16> to vector<1x8x64xbf16>
    tpu.vector_store %arg4[%c0_14, %c0_15, %c0_16], %18 {strides = array<i32>} : memref<1x8x64xbf16, #tpu.memory_space<vmem>>, vector<1x8x64xbf16>,
    return
  }
  func.func @transform_0(%arg0: i32, %arg1: i32) -> (i32, i32, i32) {
    %c0_i32 = arith.constant 0 : i32
    %c0_i32_0 = arith.constant 0 : i32
    return %arg0, %c0_i32, %arg1 : i32, i32, i32
  }
  func.func @transform_1(%arg0: i32, %arg1: i32) -> (i32, i32) {
    %c0_i32 = arith.constant 0 : i32
    %c0_i32_0 = arith.constant 0 : i32
    %c0_i32_1 = arith.constant 0 : i32
    return %c0_i32, %c0_i32_0 : i32, i32
  }
  func.func @transform_2(%arg0: i32, %arg1: i32) -> (i32, i32, i32) {
    %c0_i32 = arith.constant 0 : i32
    %c0_i32_0 = arith.constant 0 : i32
    return %arg0, %c0_i32, %arg1 : i32, i32, i32
  }
  func.func @transform_3(%arg0: i32, %arg1: i32) -> (i32, i32, i32, i32) {
    %c0_i32 = arith.constant 0 : i32
    %c0_i32_0 = arith.constant 0 : i32
    %c0_i32_1 = arith.constant 0 : i32
    return %arg0, %arg1, %c0_i32, %c0_i32_0 : i32, i32, i32, i32
  }
  func.func @transform_4(%arg0: i32, %arg1: i32) -> (i32, i32, i32, i32) {
    %c0_i32 = arith.constant 0 : i32
    %c0_i32_0 = arith.constant 0 : i32
    %c0_i32_1 = arith.constant 0 : i32
    return %arg0, %arg1, %c0_i32, %c0_i32_0 : i32, i32, i32, i32
  }
}

module attributes {stable_mosaic.version = 11 : i64} {
  func.func @_bn_lrelu_kernel(%arg0: i32, %arg1: i32, %arg2: memref<1x8x64xbf16, #tpu.memory_space<vmem>>, %arg3: memref<8x1xf32, #tpu.memory_space<vmem>>, %arg4: memref<8x1xf32, #tpu.memory_space<vmem>>, %arg5: memref<1x8x64xf32, #tpu.memory_space<vmem>>) attributes {dimension_semantics = [#tpu.dimension_semantics<parallel>, #tpu.dimension_semantics<parallel>], iteration_bounds = array<i64: 2, 1>, scalar_prefetch = 0 : i64, scratch_operands = 0 : i64, tpu.core_type = #tpu.core_type<tc>, window_params = [{transform_indices = @transform_0, window_bounds = array<i64: 1, 8, 64>}, {pipeline_mode = #tpu.pipeline_mode<synchronous>, transform_indices = @transform_1, window_bounds = array<i64: 8, 1>}, {pipeline_mode = #tpu.pipeline_mode<synchronous>, transform_indices = @transform_2, window_bounds = array<i64: 8, 1>}, {transform_indices = @transform_3, window_bounds = array<i64: 1, 8, 64>}]} {
    %c0 = arith.constant 0 : index
    %c0_0 = arith.constant 0 : index
    %c0_1 = arith.constant 0 : index
    %0 = vector.load %arg2[%c0, %c0_0, %c0_1] : memref<1x8x64xbf16, #tpu.memory_space<vmem>>, vector<1x8x64xbf16>
    %1 = vector.shape_cast %0 : vector<1x8x64xbf16> to vector<8x64xbf16>
    %2 = arith.extf %1 : vector<8x64xbf16> to vector<8x64xf32>
    %c0_2 = arith.constant 0 : index
    %c0_3 = arith.constant 0 : index
    %3 = vector.load %arg3[%c0_2, %c0_3] : memref<8x1xf32, #tpu.memory_space<vmem>>, vector<8x1xf32>
    %4 = vector.broadcast %3 : vector<8x1xf32> to vector<8x64xf32>
    %5 = arith.mulf %2, %4 : vector<8x64xf32>
    %c0_4 = arith.constant 0 : index
    %c0_5 = arith.constant 0 : index
    %6 = vector.load %arg4[%c0_4, %c0_5] : memref<8x1xf32, #tpu.memory_space<vmem>>, vector<8x1xf32>
    %7 = vector.broadcast %6 : vector<8x1xf32> to vector<8x64xf32>
    %8 = arith.addf %5, %7 : vector<8x64xf32>
    %cst = arith.constant 0.000000e+00 : f32
    %9 = vector.broadcast %cst : f32 to vector<8x64xf32>
    %10 = arith.cmpf oge, %8, %9 : vector<8x64xf32>
    %cst_6 = arith.constant 2.000000e-02 : f32
    %11 = vector.broadcast %cst_6 : f32 to vector<8x64xf32>
    %12 = arith.mulf %11, %8 : vector<8x64xf32>
    %13 = arith.select %10, %8, %12 : vector<8x64xi1>, vector<8x64xf32>
    %c0_7 = arith.constant 0 : index
    %c0_8 = arith.constant 0 : index
    %c0_9 = arith.constant 0 : index
    %14 = vector.load %arg5[%c0_7, %c0_8, %c0_9] : memref<1x8x64xf32, #tpu.memory_space<vmem>>, vector<1x8x64xf32>
    %15 = vector.shape_cast %14 : vector<1x8x64xf32> to vector<8x64xf32>
    %16 = vector.shape_cast %13 : vector<8x64xf32> to vector<1x8x64xf32>
    tpu.vector_store %arg5[%c0_7, %c0_8, %c0_9], %16 {strides = array<i32>} : memref<1x8x64xf32, #tpu.memory_space<vmem>>, vector<1x8x64xf32>,
    return
  }
  func.func @transform_0(%arg0: i32, %arg1: i32) -> (i32, i32, i32) {
    %c0_i32 = arith.constant 0 : i32
    %c0_i32_0 = arith.constant 0 : i32
    return %arg0, %c0_i32, %arg1 : i32, i32, i32
  }
  func.func @transform_1(%arg0: i32, %arg1: i32) -> (i32, i32) {
    %c0_i32 = arith.constant 0 : i32
    %c0_i32_0 = arith.constant 0 : i32
    %c0_i32_1 = arith.constant 0 : i32
    return %c0_i32, %c0_i32_0 : i32, i32
  }
  func.func @transform_2(%arg0: i32, %arg1: i32) -> (i32, i32) {
    %c0_i32 = arith.constant 0 : i32
    %c0_i32_0 = arith.constant 0 : i32
    %c0_i32_1 = arith.constant 0 : i32
    return %c0_i32, %c0_i32_0 : i32, i32
  }
  func.func @transform_3(%arg0: i32, %arg1: i32) -> (i32, i32, i32) {
    %c0_i32 = arith.constant 0 : i32
    %c0_i32_0 = arith.constant 0 : i32
    return %arg0, %c0_i32, %arg1 : i32, i32, i32
  }
}

</mosaic_0001>

<bundles_post_ra>
// kernel: downsample_block.3
= control target key start
LH: loop header
LB: loop body
LE: loop exit
PB: predicated region body
PF: predicated region fallthrough
CT: control target
= control target key end

     0   :  { %s372_s12 = smov 0   ;;  %s374_s13 = smov 0   ;;  %s411_s0 = inlined_call_operand.vmem [shape: bf16[2,8,64], index: 0, kind: input, shape index: {}]   ;;  %s412_s1 = inlined_call_operand.vmem [shape: f32[8,1], index: 1, kind: input, shape index: {}]   ;;  %s413_s2 = inlined_call_operand.vmem [shape: f32[8,1], index: 2, kind: input, shape index: {}]   ;;  %s414_s3 = inlined_call_operand.vmem [shape: f32[2,8,64], index: 3, kind: output, shape index: {}]  }
   0x1   :  { %s376_s14 = smov 0  }
   0x2 LB: > { %s25_s15 = sadd.s32 1, %s345_s13  ;;  %p296_p0 = scmp.ge.s32.totalorder %s349_s14, 1  ;;  %s349_s14 = sphi %s376_s14, %s13_s14   ;;  %s345_s13 = sphi %s374_s13, %s416_s13   ;;  %s341_s12 = sphi %s372_s12, %s415_s12  }
   0x3   : > { %p27_p1 = scmp.ge.s32.totalorder %s25_s15, 2  ;;  %p155_p2 = scmp.lt.s32.totalorder %s349_s14, 3 }
   0x5   : > { %s418_s15 = smov (%p27_p1, %s25_s15), 0  ;;  %p156_p3 = pnand %p296_p0, %p155_p2 }
   0x6   : > { %p183_p4 = scmp.lt.s32.totalorder (!%p156_p3), %s341_s12, 1 }
   0x7   : > { %159 = sbr.rel (%p156_p3) target bundleno = 143 (0x8f), region = 32 }
   0xc   : > { %v199_v0 = vld [vmem:[%s412_s1] sm:$0xff]  ;;  %v351_v1 = vmov 0   ;;  %s420_s12 = smov (!%p183_p4, %s341_s12), 1  ;;  %vm216_vm0 = vcmask 523264  }
   0xd   : > { %326 = vset.pattern.permute.xlu0 %v351_v1  ;;  %v206_v2 = vld [vmem:[%s413_s2] sm:$0xff]  ;;  %s297_s20 = sshll.u32 %s420_s12, 2  ;;  %s298_s24 = sshll.u32 %s420_s12, 3 }
   0xe   : > { %202 = vperm.xlu0 %326, %v199_v0   ;;  %s189_s23 = scalar_lea.vmem %s411_s0, %s297_s20  ;;  %s196_s27 = scalar_lea.vmem %s414_s3, %s298_s24 }
   0xf   : > { %v197_v4 = vld [vmem:[%s189_s23] sm:$0xf] }
  0x10   : > { %v198_v5 = vunpack.c.l.bf16 %v197_v4 }
  0x16   : > { %209 = vperm.xlu0 %326, %v206_v2  }
  0x80   : > { %v203_v3 = vpop.permute.xlu0 %202 }
  0x81   : > { %v205_v6 = vmul.f32 %v203_v3, %v198_v5 }
  0x88   : > { %v210_v7 = vpop.permute.xlu0 %209 }
  0x89   : > { %v212_v8 = vadd.f32 %v210_v7, %v205_v6 }
  0x8b   : > { %vm213_vm1 = vcmp.ge.f32.partialorder %v212_v8, 0.0  ;;  %v214_v9 = vmul.f32 0.02, %v212_v8 }
  0x8d   : > { %v215_v10 = vsel %vm213_vm1, %v212_v8, %v214_v9 }
  0x8e   : > { %217 = vst.msk [vmem:[%s196_s27] sm:$0xff] %vm216_vm0, %v215_v10 }
  0x8f PF: > { %s13_s14 = sadd.s32 1, %s349_s14   ;;  %s415_s12 = smov %s345_s13 }
  0x90   : > { %p10_p5 = scmp.ge.s32.totalorder %s13_s14, 4   ;;  %s416_s13 = smov %s418_s15 }
  0x92   :  { %12 = sbr.rel (!%p10_p5) target bundleno = 2 (0x2), region = 62 }

// kernel: downsample_block.2
= control target key start
LH: loop header
LB: loop body
LE: loop exit
PB: predicated region body
PF: predicated region fallthrough
CT: control target
= control target key end

     0   :  { %s641_s15 = smov 0   ;;  %s643_s16 = smov 0   ;;  %s688_s0 = inlined_call_operand.vmem [shape: bf16[2,128,64], index: 0, kind: input, shape index: {}]   ;;  %s689_s1 = inlined_call_operand.vmem [shape: bf16[8,128], index: 1, kind: input, shape index: {}]   ;;  %s690_s2 = inlined_call_operand.vmem [shape: bf16[2,8,64], index: 2, kind: output, shape index: {0}]   ;;  %s691_s3 = inlined_call_operand.vmem [shape: f32[2,1,8,1], index: 3, kind: output, shape index: {1}]   ;;  %s692_s4 = inlined_call_operand.vmem [shape: f32[2,1,8,1], index: 4, kind: output, shape index: {2}]  }
   0x1   :  { %s645_s17 = smov 0  }
   0x2 LB: > { %s27_s18 = sadd.s32 1, %s610_s16  ;;  %p519_p0 = scmp.ge.s32.totalorder %s614_s17, 1  ;;  %s614_s17 = sphi %s645_s17, %s15_s17   ;;  %s610_s16 = sphi %s643_s16, %s694_s16   ;;  %s606_s15 = sphi %s641_s15, %s693_s15  }
   0x3   : > { %p29_p1 = scmp.ge.s32.totalorder %s27_s18, 2  ;;  %p190_p2 = scmp.lt.s32.totalorder %s614_s17, 3 }
   0x5   : > { %s696_s18 = smov (%p29_p1, %s27_s18), 0  ;;  %p191_p3 = pnand %p519_p0, %p190_p2 }
   0x6   : > { %p235_p4 = scmp.lt.s32.totalorder (!%p191_p3), %s606_s15, 1 }
   0x7   : > { %194 = sbr.rel (%p191_p3) target bundleno = 299 (0x12b), region = 28 }
   0xc   : > { %s698_s15 = smov (!%p235_p4, %s606_s15), 1  ;;  %v264_v8 = vld [vmem:[%s689_s1] sm:$0xf]  ;;  %vm342_vm0 = vcmask 523264   ;;  %vm354_vm1 = vcmask 519168   ;;  %vm346_vm2 = vcmask 7168  }
   0xd   : > { %s559_s19 = sshll.u32 %s698_s15, 6  ;;  %s522_s25 = sshll.u32 %s698_s15, 2 }
   0xe   : > { %s242_s22 = scalar_lea.vmem %s688_s0, %s559_s19  ;;  %s249_s28 = scalar_lea.vmem %s690_s2, %s522_s25 }
   0xf   : > { %v567_v0 = vld [vmem:[%s242_s22 + $0x38] sm:$0xff]  ;;  %v566_v1 = vld [vmem:[%s242_s22 + $0x30] sm:$0xff]  ;;  %v565_v2 = vld [vmem:[%s242_s22 + $0x28] sm:$0xff]  ;;  %s523_s29 = sshll.u32 %s698_s15, 3 }
  0x10   : > { %329 = vmatpush.bf16.msra.mxu0 %v567_v0  ;;  %v564_v3 = vld [vmem:[%s242_s22 + $0x20] sm:$0xff]  ;;  %v563_v4 = vld [vmem:[%s242_s22 + $0x18] sm:$0xff]  ;;  %v562_v5 = vld [vmem:[%s242_s22 + $0x10] sm:$0xff]  ;;  %s256_s6 = scalar_lea.vmem %s691_s3, %s523_s29  ;;  %s263_s9 = scalar_lea.vmem %s692_s4, %s523_s29 }
  0x11   : > { %v561_v6 = vld [vmem:[%s242_s22 + $0x8] sm:$0xff]  ;;  %v560_v7 = vld [vmem:[%s242_s22] sm:$0xff] }
  0x14   : > { %330 = vmatpush.bf16.msra.mxu0 %v566_v1 }
  0x18   : > { %331 = vmatpush.bf16.msra.mxu0 %v565_v2 }
  0x1c   : > { %332 = vmatpush.bf16.msra.mxu0 %v564_v3 }
  0x20   : > { %333 = vmatpush.bf16.msra.mxu0 %v563_v4 }
  0x24   : > { %334 = vmatpush.bf16.msra.mxu0 %v562_v5 }
  0x28   : > { %335 = vmatpush.bf16.msra.mxu0 %v561_v6 }
  0x2c   : > { %336 = vmatpush.bf16.msra.mxu0 %v560_v7 }
  0x2f   : > { %337 = vmatmul.bf16.vlgmr.msra.gmra.mxu0 %v264_v8 }
  0xac   : > { %v338_v9 = vpop.f32.mrf.mxu0 }
  0xad   : > { %v353_v10 = vpack.c.bf16 %v338_v9, %v338_v9  ;;  %v343_v11 = vsel %vm342_vm0, %v338_v9, 0.0  ;;  %v348_v12 = vmul.f32 %v338_v9, %v338_v9 }
  0xae   : > { %344 = vadd.xlane.f32.xlu0 %v343_v11 }
  0xaf   : > { %355 = vst.msk [vmem:[%s249_s28] sm:$0xf] %vm354_vm1, %v353_v10  ;;  %v349_v14 = vsel %vm342_vm0, %v348_v12, 0.0 }
  0xb4   : > { %v340_v13 = vpop.f32.mrf.mxu0 }
  0xb6   : > { %350 = vadd.xlane.f32.xlu0 %v349_v14 }
 0x121   : > { %v345_v15 = vpop.xlane.xlu0 %344 }
 0x122   : > { %347 = vst.msk [vmem:[%s256_s6] sm:$0xff] %vm346_vm2, %v345_v15 }
 0x129   : > { %v351_v16 = vpop.xlane.xlu0 %350 }
 0x12a   : > { %352 = vst.msk [vmem:[%s263_s9] sm:$0xff] %vm346_vm2, %v351_v16 }
 0x12b PF: > { %s15_s17 = sadd.s32 1, %s614_s17   ;;  %s693_s15 = smov %s610_s16 }
 0x12c   : > { %p12_p5 = scmp.ge.s32.totalorder %s15_s17, 4   ;;  %s694_s16 = smov %s696_s18 }
 0x12e   :  { %14 = sbr.rel (!%p12_p5) target bundleno = 2 (0x2), region = 82 }

</bundles_post_ra>
